<compile_context>
chip_gen: v7x
topology: tpu7x:2x2x1
jax: 0.10.0
libtpu: 0.0.40
codegen_flags: <defaults>
</compile_context>

<pallas_src>
import jax
import jax.numpy as jnp
from jax.experimental import pallas as pl
from jax.experimental.pallas import tpu as pltpu

# ---- model hyperparameters (small, consistent with the module) --------------
D_MODEL = 32
D_INNER = 64
N_HEAD = 4
D_K = 8
D_V = 8
SEQ = 8
BATCH = 2
LN_EPS = 1e-5
TEMPERATURE = float(D_K) ** 0.5
NEG_INF = -1e30   # large finite negative: robust even if a row is fully masked

PARAM_ORDER = ("wq", "bq", "wk", "bk", "wv", "bv", "wo", "bo",
               "ln1w", "ln1b", "w1", "b1", "w2", "b2", "ln2w", "ln2b")


def _layer_norm(x, w, b):
    mean = jnp.mean(x, axis=-1, keepdims=True)
    var = jnp.mean(jnp.square(x - mean), axis=-1, keepdims=True)
    return (x - mean) * jax.lax.rsqrt(var + LN_EPS) * w + b


# ---- Pallas kernel: whole (B, L, D) problem in one invocation ----------------
def encoder_layer_kernel(x_ref, xg_ref, npm_ref, amask_ref,
                         wqkv_ref, bqkv_ref, wo_ref, bo_ref,
                         ln1w_ref, ln1b_ref, w1t_ref, b1_ref,
                         w2t_ref, b2_ref, ln2w_ref, ln2b_ref,
                         out_ref, attn_ref):
    # static shape bookkeeping (trace time)
    G, L, _ = xg_ref.shape            # G = n_head * B groups, g = h*B + b (torch order)
    BL = x_ref.shape[0]
    B = BL // L
    H = G // B
    dk = wqkv_ref.shape[-1] // 3
    dv = wo_ref.shape[1]
    inv_temp = 1.0 / (float(dk) ** 0.5)

    x = x_ref[...]          # (B*L, D)   residual stream, batch folded into rows
    x_g = xg_ref[...]       # (G, L, D)  per-(head, batch) replicated input
    npm = npm_ref[...]      # (B*L, D)   pre-broadcast non-pad mask
    amask = amask_ref[...]  # (G, L, L)  1.0 = masked key

    # ---- fused, head-batched Q/K/V projection: one MXU dot_general ----------
    qkv = jnp.einsum("gld,gde->gle", x_g, wqkv_ref[...],
                     preferred_element_type=jnp.float32) + bqkv_ref[...]
    q = qkv[..., :dk]
    k = qkv[..., dk:2 * dk]
    v = qkv[..., 2 * dk:2 * dk + dv]

    # ---- scaled dot-product attention (contract last dims; no transposes) ---
    scores = jnp.einsum("gqd,gkd->gqk", q, k,
                        preferred_element_type=jnp.float32) * inv_temp
    scores = jnp.where(amask > 0, NEG_INF, scores)
    m = jnp.max(scores, axis=-1, keepdims=True)
    e = jnp.exp(scores - m)
    attn = e * pl.reciprocal(jnp.sum(e, axis=-1, keepdims=True), approx=True)
    attn_ref[...] = attn                      # single stacked store, torch order

    ctx = jnp.einsum("gqk,gkd->gqd", attn, v,
                     preferred_element_type=jnp.float32)            # (G, L, d_v)
    mha_g = jnp.einsum("glv,gvd->gld", ctx, wo_ref[...],
                       preferred_element_type=jnp.float32)          # (G, L, D)

    # reduce per-head partial output projections; fold batch back into rows
    mha = jnp.concatenate(
        [sum(mha_g[h * B + b] for h in range(H)) for b in range(B)],
        axis=0) + bo_ref[...]                                       # (B*L, D)

    y = _layer_norm(mha + x, ln1w_ref[...], ln1b_ref[...]) * npm

    # ---- position-wise FFN (Conv1d k=1 == Linear), pre-transposed weights ---
    hdn = jnp.dot(y, w1t_ref[...], preferred_element_type=jnp.float32) + b1_ref[...]
    hdn = jnp.maximum(hdn, 0.0)
    hdn = jnp.dot(hdn, w2t_ref[...], preferred_element_type=jnp.float32) + b2_ref[...]
    z = _layer_norm(hdn + y, ln2w_ref[...], ln2b_ref[...]) * npm

    out_ref[...] = z                           # single (B*L, D) store


# ---- wrapper -----------------------------------------------------------------
def encoder_layer(enc_input, non_pad_mask, slf_attn_mask, params):
    B, L, D = enc_input.shape
    G = N_HEAD * B
    p = params

    # host-side packing: pure layout plumbing, traced as ordinary XLA ops
    x_flat = enc_input.reshape(B * L, D)
    x_rep = jnp.broadcast_to(enc_input[None], (N_HEAD, B, L, D)).reshape(G, L, D)
    npm_flat = jnp.broadcast_to(non_pad_mask, (B, L, D)).reshape(B * L, D)
    amask_g = jnp.tile(slf_attn_mask, (N_HEAD, 1, 1))               # (G, L, L)

    def per_head_t(w, dh):   # torch Linear weight (H*dh, D) -> (H, D, dh)
        return jnp.transpose(w.reshape(N_HEAD, dh, D), (0, 2, 1))

    wqkv = jnp.concatenate([per_head_t(p["wq"], D_K),
                            per_head_t(p["wk"], D_K),
                            per_head_t(p["wv"], D_V)], axis=-1)     # (H, D, 3*d_k)
    wqkv = jnp.repeat(wqkv, B, axis=0)                              # (G, D, 3*d_k)
    bqkv = jnp.concatenate([p["bq"].reshape(N_HEAD, D_K),
                            p["bk"].reshape(N_HEAD, D_K),
                            p["bv"].reshape(N_HEAD, D_V)], axis=-1)  # (H, 3*d_k)
    bqkv = jnp.repeat(bqkv, B, axis=0)[:, None, :]                  # (G, 1, 3*d_k)
    wo_g = jnp.repeat(p["wo"].T.reshape(N_HEAD, D_V, D), B, axis=0)  # (G, d_v, D)

    inputs = (x_flat, x_rep, npm_flat, amask_g,
              wqkv, bqkv, wo_g, p["bo"],
              p["ln1w"], p["ln1b"], p["w1"].T, p["b1"],
              p["w2"].T, p["b2"], p["ln2w"], p["ln2b"])

    vmem = pl.BlockSpec(memory_space=pltpu.MemorySpace.VMEM)
    out_flat, attn = pl.pallas_call(
        encoder_layer_kernel,
        in_specs=[vmem] * len(inputs),
        out_specs=(vmem, vmem),
        out_shape=(jax.ShapeDtypeStruct((B * L, D), jnp.float32),
                   jax.ShapeDtypeStruct((G, L, L), jnp.float32)),
    )(*inputs)

    # attn is already in the torch (n_head * B, L, L) head-major order
    return out_flat.reshape(B, L, D), attn


# ---- pure-JAX reference (mirrors the PyTorch forward, eval mode) --------------
def ref_encoder_layer(x, npm, amask, p):
    B, L, D = x.shape
    q = (x @ p["wq"].T + p["bq"]).reshape(B, L, N_HEAD, D_K)
    k = (x @ p["wk"].T + p["bk"]).reshape(B, L, N_HEAD, D_K)
    v = (x @ p["wv"].T + p["bv"]).reshape(B, L, N_HEAD, D_V)
    scores = jnp.einsum("bqhd,bkhd->bhqk", q, k) / TEMPERATURE
    scores = jnp.where(amask[:, None, :, :] > 0, -jnp.inf, scores)
    m = jnp.max(scores, axis=-1, keepdims=True)
    e = jnp.exp(scores - m)
    attn = e / jnp.sum(e, axis=-1, keepdims=True)
    ctx = jnp.einsum("bhqk,bkhd->bqhd", attn, v).reshape(B, L, N_HEAD * D_V)
    mha = ctx @ p["wo"].T + p["bo"]
    y = _layer_norm(mha + x, p["ln1w"], p["ln1b"]) * npm
    h = jnp.maximum(y @ p["w1"].T + p["b1"], 0.0)
    h = h @ p["w2"].T + p["b2"]
    z = _layer_norm(h + y, p["ln2w"], p["ln2b"]) * npm
    attn = jnp.transpose(attn, (1, 0, 2, 3)).reshape(N_HEAD * B, L, L)
    return z, attn


def init_params(key):
    ks = jax.random.split(key, len(PARAM_ORDER))
    shapes = {
        "wq": (N_HEAD * D_K, D_MODEL), "bq": (1, N_HEAD * D_K),
        "wk": (N_HEAD * D_K, D_MODEL), "bk": (1, N_HEAD * D_K),
        "wv": (N_HEAD * D_V, D_MODEL), "bv": (1, N_HEAD * D_V),
        "wo": (D_MODEL, N_HEAD * D_V), "bo": (1, D_MODEL),
        "ln1w": (1, D_MODEL), "ln1b": (1, D_MODEL),
        "w1": (D_INNER, D_MODEL), "b1": (1, D_INNER),   # Conv1d(d_model, d_inner, 1)
        "w2": (D_MODEL, D_INNER), "b2": (1, D_MODEL),   # Conv1d(d_inner, d_model, 1)
        "ln2w": (1, D_MODEL), "ln2b": (1, D_MODEL),
    }
    params = {}
    for name, k in zip(PARAM_ORDER, ks):
        scale = 0.02 if name.startswith(("w",)) else 0.1
        params[name] = jax.random.normal(k, shapes[name], jnp.float32) * scale
    # LayerNorm defaults in torch: weight=1, bias=0; perturb slightly but keep deterministic.
    params["ln1w"] = 1.0 + 0.1 * params["ln1w"]
    params["ln2w"] = 1.0 + 0.1 * params["ln2w"]
    return params


if __name__ == "__main__":
    key = jax.random.PRNGKey(0)
    k_in, k_par = jax.random.split(key)

    enc_input = jax.random.normal(k_in, (BATCH, SEQ, D_MODEL), jnp.float32)

    # sequence lengths [8, 6] -> padding masks
    seq_lens = jnp.array([SEQ, SEQ - 2], dtype=jnp.int32)
    pos = jnp.arange(SEQ)
    non_pad_mask = (pos[None, :] < seq_lens[:, None]).astype(jnp.float32)[..., None]   # (B, L, 1)
    key_pad = (pos[None, :] >= seq_lens[:, None]).astype(jnp.float32)                   # (B, L)
    slf_attn_mask = jnp.broadcast_to(key_pad[:, None, :], (BATCH, SEQ, SEQ)).astype(jnp.float32)

    params = init_params(k_par)

    enc_out, attn = encoder_layer(enc_input, non_pad_mask, slf_attn_mask, params)
    enc_out = jax.block_until_ready(enc_out)
    attn = jax.block_until_ready(attn)

    ref_out, ref_attn = ref_encoder_layer(enc_input, non_pad_mask, slf_attn_mask, params)

    assert enc_out.shape == (BATCH, SEQ, D_MODEL)
    assert attn.shape == (N_HEAD * BATCH, SEQ, SEQ)
    # tolerance accounts for the EUP approximate reciprocal in the softmax and
    # the per-head re-associated output-projection sum
    assert jnp.allclose(enc_out, ref_out, rtol=2e-3, atol=1e-3), "enc_output mismatch"
    assert jnp.allclose(attn, ref_attn, rtol=2e-3, atol=1e-3), "attention mismatch"

    print("KERNEL_OK")
</pallas_src>

<mosaic_0001>
module attributes {stable_mosaic.version = 11 : i64} {
  func.func @encoder_layer_kernel(%arg0: memref<16x32xf32, #tpu.memory_space<vmem>>, %arg1: memref<8x8x32xf32, #tpu.memory_space<vmem>>, %arg2: memref<16x32xf32, #tpu.memory_space<vmem>>, %arg3: memref<8x8x8xf32, #tpu.memory_space<vmem>>, %arg4: memref<8x32x24xf32, #tpu.memory_space<vmem>>, %arg5: memref<8x1x24xf32, #tpu.memory_space<vmem>>, %arg6: memref<8x8x32xf32, #tpu.memory_space<vmem>>, %arg7: memref<1x32xf32, #tpu.memory_space<vmem>>, %arg8: memref<1x32xf32, #tpu.memory_space<vmem>>, %arg9: memref<1x32xf32, #tpu.memory_space<vmem>>, %arg10: memref<32x64xf32, #tpu.memory_space<vmem>>, %arg11: memref<1x64xf32, #tpu.memory_space<vmem>>, %arg12: memref<64x32xf32, #tpu.memory_space<vmem>>, %arg13: memref<1x32xf32, #tpu.memory_space<vmem>>, %arg14: memref<1x32xf32, #tpu.memory_space<vmem>>, %arg15: memref<1x32xf32, #tpu.memory_space<vmem>>, %arg16: memref<16x32xf32, #tpu.memory_space<vmem>>, %arg17: memref<8x8x8xf32, #tpu.memory_space<vmem>>) attributes {dimension_semantics = [], scalar_prefetch = 0 : i64, scratch_operands = 0 : i64, tpu.core_type = #tpu.core_type<tc>} {
    %c0 = arith.constant 0 : index
    %c0_0 = arith.constant 0 : index
    %0 = vector.load %arg0[%c0, %c0_0] : memref<16x32xf32, #tpu.memory_space<vmem>>, vector<16x32xf32>
    %c0_1 = arith.constant 0 : index
    %c0_2 = arith.constant 0 : index
    %c0_3 = arith.constant 0 : index
    %1 = vector.load %arg1[%c0_1, %c0_2, %c0_3] : memref<8x8x32xf32, #tpu.memory_space<vmem>>, vector<8x8x32xf32>
    %c0_4 = arith.constant 0 : index
    %c0_5 = arith.constant 0 : index
    %2 = vector.load %arg2[%c0_4, %c0_5] : memref<16x32xf32, #tpu.memory_space<vmem>>, vector<16x32xf32>
    %c0_6 = arith.constant 0 : index
    %c0_7 = arith.constant 0 : index
    %c0_8 = arith.constant 0 : index
    %3 = vector.load %arg3[%c0_6, %c0_7, %c0_8] : memref<8x8x8xf32, #tpu.memory_space<vmem>>, vector<8x8x8xf32>
    %c0_9 = arith.constant 0 : index
    %c0_10 = arith.constant 0 : index
    %c0_11 = arith.constant 0 : index
    %4 = vector.load %arg4[%c0_9, %c0_10, %c0_11] : memref<8x32x24xf32, #tpu.memory_space<vmem>>, vector<8x32x24xf32>
    "tpu.trace_start"() <{level = 10 : i32, message = "gld,gde->gle"}> : () -> ()
    %cst = arith.constant dense<0.000000e+00> : vector<8x8x24xf32>
    %5 = tpu.matmul %1, %4, %cst {dimension_numbers = #tpu.dot_dimension_numbers<[2], [1], [1], [2], [0, 0, 0, 1, 1, 2], [0], [0]>} : vector<8x8x32xf32>, vector<8x32x24xf32>, vector<8x8x24xf32> -> vector<8x8x24xf32>
    "tpu.trace_stop"() : () -> ()
    %c0_12 = arith.constant 0 : index
    %c0_13 = arith.constant 0 : index
    %c0_14 = arith.constant 0 : index
    %6 = vector.load %arg5[%c0_12, %c0_13, %c0_14] : memref<8x1x24xf32, #tpu.memory_space<vmem>>, vector<8x1x24xf32>
    %7 = vector.broadcast %6 : vector<8x1x24xf32> to vector<8x8x24xf32>
    %8 = arith.addf %5, %7 : vector<8x8x24xf32>
    %9 = vector.extract_strided_slice %8 {offsets = [0, 0, 0], sizes = [8, 8, 8], strides = [1, 1, 1]} : vector<8x8x24xf32> to vector<8x8x8xf32>
    %10 = vector.extract_strided_slice %8 {offsets = [0, 0, 8], sizes = [8, 8, 8], strides = [1, 1, 1]} : vector<8x8x24xf32> to vector<8x8x8xf32>
    %11 = vector.extract_strided_slice %8 {offsets = [0, 0, 16], sizes = [8, 8, 8], strides = [1, 1, 1]} : vector<8x8x24xf32> to vector<8x8x8xf32>
    "tpu.trace_start"() <{level = 10 : i32, message = "gqd,gkd->gqk"}> : () -> ()
    %cst_15 = arith.constant dense<0.000000e+00> : vector<8x8x8xf32>
    %12 = tpu.matmul %9, %10, %cst_15 {dimension_numbers = #tpu.dot_dimension_numbers<[2], [2], [1], [1], [0, 0, 0, 1, 1, 1], [0], [0]>} : vector<8x8x8xf32>, vector<8x8x8xf32>, vector<8x8x8xf32> -> vector<8x8x8xf32>
    "tpu.trace_stop"() : () -> ()
    %cst_16 = arith.constant 0.353553385 : f32
    %13 = vector.broadcast %cst_16 : f32 to vector<8x8x8xf32>
    %14 = arith.mulf %12, %13 : vector<8x8x8xf32>
    %cst_17 = arith.constant 0.000000e+00 : f32
    %15 = vector.broadcast %cst_17 : f32 to vector<8x8x8xf32>
    %16 = arith.cmpf ogt, %3, %15 : vector<8x8x8xf32>
    %cst_18 = arith.constant -1.000000e+30 : f32
    %17 = vector.broadcast %cst_18 : f32 to vector<8x8x8xf32>
    %18 = arith.select %16, %17, %14 : vector<8x8x8xi1>, vector<8x8x8xf32>
    %cst_19 = arith.constant dense<0xFF800000> : vector<8x8xf32>
    %19 = vector.multi_reduction <maximumf>, %18, %cst_19 [2] : vector<8x8x8xf32> to vector<8x8xf32>
    %20 = vector.shape_cast %19 : vector<8x8xf32> to vector<8x8x1xf32>
    %21 = vector.broadcast %20 : vector<8x8x1xf32> to vector<8x8x8xf32>
    %22 = arith.subf %18, %21 : vector<8x8x8xf32>
    %23 = math.exp %22 : vector<8x8x8xf32>
    %cst_20 = arith.constant dense<0.000000e+00> : vector<8x8xf32>
    %24 = vector.multi_reduction <add>, %23, %cst_20 [2] : vector<8x8x8xf32> to vector<8x8xf32>
    %25 = vector.shape_cast %24 : vector<8x8xf32> to vector<8x8x1xf32>
    %26 = tpu.reciprocal %25 {approx = true} : vector<8x8x1xf32> -> vector<8x8x1xf32>
    %27 = vector.broadcast %26 : vector<8x8x1xf32> to vector<8x8x8xf32>
    %28 = arith.mulf %23, %27 : vector<8x8x8xf32>
    %c0_21 = arith.constant 0 : index
    %c0_22 = arith.constant 0 : index
    %c0_23 = arith.constant 0 : index
    %29 = vector.load %arg17[%c0_21, %c0_22, %c0_23] : memref<8x8x8xf32, #tpu.memory_space<vmem>>, vector<8x8x8xf32>
    tpu.vector_store %arg17[%c0_21, %c0_22, %c0_23], %28 {strides = array<i32>} : memref<8x8x8xf32, #tpu.memory_space<vmem>>, vector<8x8x8xf32>,
    "tpu.trace_start"() <{level = 10 : i32, message = "gqk,gkd->gqd"}> : () -> ()
    %cst_24 = arith.constant dense<0.000000e+00> : vector<8x8x8xf32>
    %30 = tpu.matmul %28, %11, %cst_24 {dimension_numbers = #tpu.dot_dimension_numbers<[2], [1], [1], [2], [0, 0, 0, 1, 1, 2], [0], [0]>} : vector<8x8x8xf32>, vector<8x8x8xf32>, vector<8x8x8xf32> -> vector<8x8x8xf32>
    "tpu.trace_stop"() : () -> ()
    %c0_25 = arith.constant 0 : index
    %c0_26 = arith.constant 0 : index
    %c0_27 = arith.constant 0 : index
    %31 = vector.load %arg6[%c0_25, %c0_26, %c0_27] : memref<8x8x32xf32, #tpu.memory_space<vmem>>, vector<8x8x32xf32>
    "tpu.trace_start"() <{level = 10 : i32, message = "glv,gvd->gld"}> : () -> ()
    %cst_28 = arith.constant dense<0.000000e+00> : vector<8x8x32xf32>
    %32 = tpu.matmul %30, %31, %cst_28 {dimension_numbers = #tpu.dot_dimension_numbers<[2], [1], [1], [2], [0, 0, 0, 1, 1, 2], [0], [0]>} : vector<8x8x8xf32>, vector<8x8x32xf32>, vector<8x8x32xf32> -> vector<8x8x32xf32>
    "tpu.trace_stop"() : () -> ()
    %33 = vector.extract_strided_slice %32 {offsets = [0, 0, 0], sizes = [1, 8, 32], strides = [1, 1, 1]} : vector<8x8x32xf32> to vector<1x8x32xf32>
    %34 = vector.shape_cast %33 : vector<1x8x32xf32> to vector<8x32xf32>
    %cst_29 = arith.constant 0.000000e+00 : f32
    %35 = vector.broadcast %cst_29 : f32 to vector<8x32xf32>
    %36 = arith.addf %35, %34 : vector<8x32xf32>
    %37 = vector.extract_strided_slice %32 {offsets = [2, 0, 0], sizes = [1, 8, 32], strides = [1, 1, 1]} : vector<8x8x32xf32> to vector<1x8x32xf32>
    %38 = vector.shape_cast %37 : vector<1x8x32xf32> to vector<8x32xf32>
    %39 = arith.addf %36, %38 : vector<8x32xf32>
    %40 = vector.extract_strided_slice %32 {offsets = [4, 0, 0], sizes = [1, 8, 32], strides = [1, 1, 1]} : vector<8x8x32xf32> to vector<1x8x32xf32>
    %41 = vector.shape_cast %40 : vector<1x8x32xf32> to vector<8x32xf32>
    %42 = arith.addf %39, %41 : vector<8x32xf32>
    %43 = vector.extract_strided_slice %32 {offsets = [6, 0, 0], sizes = [1, 8, 32], strides = [1, 1, 1]} : vector<8x8x32xf32> to vector<1x8x32xf32>
    %44 = vector.shape_cast %43 : vector<1x8x32xf32> to vector<8x32xf32>
    %45 = arith.addf %42, %44 : vector<8x32xf32>
    %46 = vector.extract_strided_slice %32 {offsets = [1, 0, 0], sizes = [1, 8, 32], strides = [1, 1, 1]} : vector<8x8x32xf32> to vector<1x8x32xf32>
    %47 = vector.shape_cast %46 : vector<1x8x32xf32> to vector<8x32xf32>
    %cst_30 = arith.constant 0.000000e+00 : f32
    %48 = vector.broadcast %cst_30 : f32 to vector<8x32xf32>
    %49 = arith.addf %48, %47 : vector<8x32xf32>
    %50 = vector.extract_strided_slice %32 {offsets = [3, 0, 0], sizes = [1, 8, 32], strides = [1, 1, 1]} : vector<8x8x32xf32> to vector<1x8x32xf32>
    %51 = vector.shape_cast %50 : vector<1x8x32xf32> to vector<8x32xf32>
    %52 = arith.addf %49, %51 : vector<8x32xf32>
    %53 = vector.extract_strided_slice %32 {offsets = [5, 0, 0], sizes = [1, 8, 32], strides = [1, 1, 1]} : vector<8x8x32xf32> to vector<1x8x32xf32>
    %54 = vector.shape_cast %53 : vector<1x8x32xf32> to vector<8x32xf32>
    %55 = arith.addf %52, %54 : vector<8x32xf32>
    %56 = vector.extract_strided_slice %32 {offsets = [7, 0, 0], sizes = [1, 8, 32], strides = [1, 1, 1]} : vector<8x8x32xf32> to vector<1x8x32xf32>
    %57 = vector.shape_cast %56 : vector<1x8x32xf32> to vector<8x32xf32>
    %58 = arith.addf %55, %57 : vector<8x32xf32>
    %59 = tpu.concatenate %45, %58 in 0 : vector<8x32xf32>, vector<8x32xf32> -> vector<16x32xf32>
    %c0_31 = arith.constant 0 : index
    %c0_32 = arith.constant 0 : index
    %60 = vector.load %arg7[%c0_31, %c0_32] : memref<1x32xf32, #tpu.memory_space<vmem>>, vector<1x32xf32>
    %61 = vector.broadcast %60 : vector<1x32xf32> to vector<16x32xf32>
    %62 = arith.addf %59, %61 : vector<16x32xf32>
    %63 = arith.addf %62, %0 : vector<16x32xf32>
    %c0_33 = arith.constant 0 : index
    %c0_34 = arith.constant 0 : index
    %64 = vector.load %arg8[%c0_33, %c0_34] : memref<1x32xf32, #tpu.memory_space<vmem>>, vector<1x32xf32>
    %c0_35 = arith.constant 0 : index
    %c0_36 = arith.constant 0 : index
    %65 = vector.load %arg9[%c0_35, %c0_36] : memref<1x32xf32, #tpu.memory_space<vmem>>, vector<1x32xf32>
    %cst_37 = arith.constant dense<0.000000e+00> : vector<16xf32>
    %66 = vector.multi_reduction <add>, %63, %cst_37 [1] : vector<16x32xf32> to vector<16xf32>
    %67 = vector.shape_cast %66 : vector<16xf32> to vector<16x1xf32>
    %cst_38 = arith.constant 3.200000e+01 : f32
    %68 = vector.broadcast %cst_38 : f32 to vector<16x1xf32>
    %69 = arith.divf %67, %68 : vector<16x1xf32>
    %70 = vector.broadcast %69 : vector<16x1xf32> to vector<16x32xf32>
    %71 = arith.subf %63, %70 : vector<16x32xf32>
    %72 = arith.mulf %71, %71 : vector<16x32xf32>
    %cst_39 = arith.constant dense<0.000000e+00> : vector<16xf32>
    %73 = vector.multi_reduction <add>, %72, %cst_39 [1] : vector<16x32xf32> to vector<16xf32>
    %74 = vector.shape_cast %73 : vector<16xf32> to vector<16x1xf32>
    %cst_40 = arith.constant 3.200000e+01 : f32
    %75 = vector.broadcast %cst_40 : f32 to vector<16x1xf32>
    %76 = arith.divf %74, %75 : vector<16x1xf32>
    %77 = vector.broadcast %69 : vector<16x1xf32> to vector<16x32xf32>
    %78 = arith.subf %63, %77 : vector<16x32xf32>
    %cst_41 = arith.constant 9.99999974E-6 : f32
    %79 = vector.broadcast %cst_41 : f32 to vector<16x1xf32>
    %80 = arith.addf %76, %79 : vector<16x1xf32>
    %81 = math.rsqrt %80 : vector<16x1xf32>
    %82 = vector.broadcast %81 : vector<16x1xf32> to vector<16x32xf32>
    %83 = arith.mulf %78, %82 : vector<16x32xf32>
    %84 = vector.broadcast %64 : vector<1x32xf32> to vector<16x32xf32>
    %85 = arith.mulf %83, %84 : vector<16x32xf32>
    %86 = vector.broadcast %65 : vector<1x32xf32> to vector<16x32xf32>
    %87 = arith.addf %85, %86 : vector<16x32xf32>
    %88 = arith.mulf %87, %2 : vector<16x32xf32>
    %c0_42 = arith.constant 0 : index
    %c0_43 = arith.constant 0 : index
    %89 = vector.load %arg10[%c0_42, %c0_43] : memref<32x64xf32, #tpu.memory_space<vmem>>, vector<32x64xf32>
    %cst_44 = arith.constant dense<0.000000e+00> : vector<16x64xf32>
    %90 = tpu.matmul %88, %89, %cst_44 {dimension_numbers = #tpu.dot_dimension_numbers<[1], [0], [0], [1], [0, 0, 1, 1], [], []>} : vector<16x32xf32>, vector<32x64xf32>, vector<16x64xf32> -> vector<16x64xf32>
    %c0_45 = arith.constant 0 : index
    %c0_46 = arith.constant 0 : index
    %91 = vector.load %arg11[%c0_45, %c0_46] : memref<1x64xf32, #tpu.memory_space<vmem>>, vector<1x64xf32>
    %92 = vector.broadcast %91 : vector<1x64xf32> to vector<16x64xf32>
    %93 = arith.addf %90, %92 : vector<16x64xf32>
    %cst_47 = arith.constant 0.000000e+00 : f32
    %94 = vector.broadcast %cst_47 : f32 to vector<16x64xf32>
    %95 = arith.maximumf %93, %94 : vector<16x64xf32>
    %c0_48 = arith.constant 0 : index
    %c0_49 = arith.constant 0 : index
    %96 = vector.load %arg12[%c0_48, %c0_49] : memref<64x32xf32, #tpu.memory_space<vmem>>, vector<64x32xf32>
    %cst_50 = arith.constant dense<0.000000e+00> : vector<16x32xf32>
    %97 = tpu.matmul %95, %96, %cst_50 {dimension_numbers = #tpu.dot_dimension_numbers<[1], [0], [0], [1], [0, 0, 1, 1], [], []>} : vector<16x64xf32>, vector<64x32xf32>, vector<16x32xf32> -> vector<16x32xf32>
    %c0_51 = arith.constant 0 : index
    %c0_52 = arith.constant 0 : index
    %98 = vector.load %arg13[%c0_51, %c0_52] : memref<1x32xf32, #tpu.memory_space<vmem>>, vector<1x32xf32>
    %99 = vector.broadcast %98 : vector<1x32xf32> to vector<16x32xf32>
    %100 = arith.addf %97, %99 : vector<16x32xf32>
    %101 = arith.addf %100, %88 : vector<16x32xf32>
    %c0_53 = arith.constant 0 : index
    %c0_54 = arith.constant 0 : index
    %102 = vector.load %arg14[%c0_53, %c0_54] : memref<1x32xf32, #tpu.memory_space<vmem>>, vector<1x32xf32>
    %c0_55 = arith.constant 0 : index
    %c0_56 = arith.constant 0 : index
    %103 = vector.load %arg15[%c0_55, %c0_56] : memref<1x32xf32, #tpu.memory_space<vmem>>, vector<1x32xf32>
    %cst_57 = arith.constant dense<0.000000e+00> : vector<16xf32>
    %104 = vector.multi_reduction <add>, %101, %cst_57 [1] : vector<16x32xf32> to vector<16xf32>
    %105 = vector.shape_cast %104 : vector<16xf32> to vector<16x1xf32>
    %cst_58 = arith.constant 3.200000e+01 : f32
    %106 = vector.broadcast %cst_58 : f32 to vector<16x1xf32>
    %107 = arith.divf %105, %106 : vector<16x1xf32>
    %108 = vector.broadcast %107 : vector<16x1xf32> to vector<16x32xf32>
    %109 = arith.subf %101, %108 : vector<16x32xf32>
    %110 = arith.mulf %109, %109 : vector<16x32xf32>
    %cst_59 = arith.constant dense<0.000000e+00> : vector<16xf32>
    %111 = vector.multi_reduction <add>, %110, %cst_59 [1] : vector<16x32xf32> to vector<16xf32>
    %112 = vector.shape_cast %111 : vector<16xf32> to vector<16x1xf32>
    %cst_60 = arith.constant 3.200000e+01 : f32
    %113 = vector.broadcast %cst_60 : f32 to vector<16x1xf32>
    %114 = arith.divf %112, %113 : vector<16x1xf32>
    %115 = vector.broadcast %107 : vector<16x1xf32> to vector<16x32xf32>
    %116 = arith.subf %101, %115 : vector<16x32xf32>
    %cst_61 = arith.constant 9.99999974E-6 : f32
    %117 = vector.broadcast %cst_61 : f32 to vector<16x1xf32>
    %118 = arith.addf %114, %117 : vector<16x1xf32>
    %119 = math.rsqrt %118 : vector<16x1xf32>
    %120 = vector.broadcast %119 : vector<16x1xf32> to vector<16x32xf32>
    %121 = arith.mulf %116, %120 : vector<16x32xf32>
    %122 = vector.broadcast %102 : vector<1x32xf32> to vector<16x32xf32>
    %123 = arith.mulf %121, %122 : vector<16x32xf32>
    %124 = vector.broadcast %103 : vector<1x32xf32> to vector<16x32xf32>
    %125 = arith.addf %123, %124 : vector<16x32xf32>
    %126 = arith.mulf %125, %2 : vector<16x32xf32>
    %c0_62 = arith.constant 0 : index
    %c0_63 = arith.constant 0 : index
    %127 = vector.load %arg16[%c0_62, %c0_63] : memref<16x32xf32, #tpu.memory_space<vmem>>, vector<16x32xf32>
    tpu.vector_store %arg16[%c0_62, %c0_63], %126 {strides = array<i32>} : memref<16x32xf32, #tpu.memory_space<vmem>>, vector<16x32xf32>,
    return
  }
}

</mosaic_0001>

<bundles_post_ra>
// kernel: tpu_custom_call.1
= control target key start
LH: loop header
LB: loop body
LE: loop exit
PB: predicated region body
PF: predicated region fallthrough
CT: control target
= control target key end

     0   :  { %s4262_s0 = inlined_call_operand.vmem [shape: f32[16,32], index: 0, kind: input, shape index: {}]   ;;  %s4263_s1 = inlined_call_operand.vmem [shape: f32[8,8,32], index: 1, kind: input, shape index: {}]   ;;  %s4264_s2 = inlined_call_operand.vmem [shape: f32[16,32], index: 2, kind: input, shape index: {}]   ;;  %s4265_s3 = inlined_call_operand.vmem [shape: f32[8,8,8], index: 3, kind: input, shape index: {}]   ;;  %s4266_s4 = inlined_call_operand.vmem [shape: f32[8,32,24], index: 4, kind: input, shape index: {}]   ;;  %s4267_s5 = inlined_call_operand.vmem [shape: f32[8,1,24], index: 5, kind: input, shape index: {}]   ;;  %s4268_s6 = inlined_call_operand.vmem [shape: f32[8,8,32], index: 6, kind: input, shape index: {}]   ;;  %s4269_s7 = inlined_call_operand.vmem [shape: f32[1,32], index: 7, kind: input, shape index: {}]   ;;  %s4270_s8 = inlined_call_operand.vmem [shape: f32[1,32], index: 8, kind: input, shape index: {}]   ;;  %s4271_s9 = inlined_call_operand.vmem [shape: f32[1,32], index: 9, kind: input, shape index: {}]   ;;  %s4272_s10 = inlined_call_operand.vmem [shape: f32[32,64], index: 10, kind: input, shape index: {}]   ;;  %s4273_s11 = inlined_call_operand.vmem [shape: f32[1,64], index: 11, kind: input, shape index: {}]   ;;  %s4274_s12 = inlined_call_operand.vmem [shape: f32[64,32], index: 12, kind: input, shape index: {}]   ;;  %s4275_s13 = inlined_call_operand.vmem [shape: f32[1,32], index: 13, kind: input, shape index: {}]   ;;  %s4276_s14 = inlined_call_operand.vmem [shape: f32[1,32], index: 14, kind: input, shape index: {}]   ;;  %s4277_s15 = inlined_call_operand.vmem [shape: f32[1,32], index: 15, kind: input, shape index: {}]   ;;  %s4278_s16 = inlined_call_operand.hbm [shape: f32[16,32], index: 16, kind: output, shape index: {0}]   ;;  %s4279_s17 = inlined_call_operand.hbm [shape: f32[8,8,8], index: 17, kind: output, shape index: {1}]  }
   0x1   :  { %4282 = sst [smem:[#allocation8_spill]] %s4262_s0 }
   0x2   :  { %4283 = sst [smem:[#allocation9_spill]] %s4263_s1 }
   0x3   :  { %23 = vsyncpa [#allocation3], 0  ;;  %v77_v0 = vld [vmem:[%s4266_s4] sm:$0xff]  ;;  %v78_v1 = vld [vmem:[%s4266_s4 + $0x8] sm:$0xff]  ;;  %v3596_v3 = vmov 0.0|0.0   ;;  %vm3597_vm0 = vmmov 0  }
   0x4   :  { %v81_v2 = vld [vmem:[%s4266_s4 + $0x20] sm:$0xff]  ;;  %3427 = vmatprep.subr.bf16.mxu0 %v3596_v3  ;;  %3433 = vmatprep.subr.bf16.mxu1 %v3596_v3  ;;  %v3428_v4 = vpack.c.bf16 %v78_v1, %v77_v0  ;;  %v82_v5 = vld [vmem:[%s4266_s4 + $0x28] sm:$0xff]  ;;  %v79_v6 = vld [vmem:[%s4266_s4 + $0x10] sm:$0xff]  ;;  %v3598_v11 = vmov 0.0   ;;  %s4284_s20 = sld [smem:[#allocation9_spill]]  ;;  %vm165_vm1 = vcmask 261120  }
   0x5   :  { %v80_v7 = vld [vmem:[%s4266_s4 + $0x18] sm:$0xff]  ;;  %v3434_v8 = vpack.c.bf16 %v82_v5, %v81_v2  ;;  %v83_v9 = vld [vmem:[%s4266_s4 + $0x30] sm:$0xff]  ;;  %3197 = vmatprep.mubr.msk.f32.mxu0 %vm3597_vm0, %v3598_v11  ;;  %3208 = vmatprep.mubr.msk.f32.mxu1 %vm3597_vm0, %v3598_v11  ;;  %v85_v14 = vld [vmem:[%s4266_s4 + $0x40] sm:$0xff] }
   0x6   :  { %v84_v10 = vld [vmem:[%s4266_s4 + $0x38] sm:$0xff]  ;;  %3429 = vmatpush3.bf16.msra.mxu0 %v3428_v4  ;;  %v3431_v12 = vpack.c.bf16 %v80_v7, %v79_v6  ;;  %v86_v15 = vld [vmem:[%s4266_s4 + $0x48] sm:$0xff]  ;;  %v89_v16 = vld [vmem:[%s4266_s4 + $0x60] sm:$0xff] }
   0x7   :  { %3435 = vmatpush3.bf16.msra.mxu1 %v3434_v8  ;;  %3430 = vmatprep.subr.bf16.mxu0 %v3596_v3  ;;  %v3437_v13 = vpack.c.bf16 %v84_v10, %v83_v9  ;;  %v90_v17 = vld [vmem:[%s4266_s4 + $0x68] sm:$0xff]  ;;  %v3440_v19 = vpack.c.bf16 %v86_v15, %v85_v14  ;;  %v87_v22 = vld [vmem:[%s4266_s4 + $0x50] sm:$0xff]  ;;  %v88_v23 = vld [vmem:[%s4266_s4 + $0x58] sm:$0xff] }
   0x8   :  { %3436 = vmatprep.subr.bf16.mxu1 %v3596_v3  ;;  %v3446_v21 = vpack.c.bf16 %v90_v17, %v89_v16  ;;  %v91_v24 = vld [vmem:[%s4266_s4 + $0x70] sm:$0xff]  ;;  %v92_v25 = vld [vmem:[%s4266_s4 + $0x78] sm:$0xff]  ;;  %v3443_v26 = vpack.c.bf16 %v88_v23, %v87_v22  ;;  %v93_v28 = vld [vmem:[%s4266_s4 + $0x80] sm:$0xff] }
   0x9   :  { %v3449_v27 = vpack.c.bf16 %v92_v25, %v91_v24  ;;  %v94_v29 = vld [vmem:[%s4266_s4 + $0x88] sm:$0xff]  ;;  %v97_v30 = vld [vmem:[%s4266_s4 + $0xa0] sm:$0xff] }
   0xa   :  { %3432 = vmatpush3.bf16.msra.mxu0 %v3431_v12  ;;  %v59_v18 = vld [vmem:[%s4284_s20] sm:$0xff]  ;;  %v60_v20 = vld [vmem:[%s4284_s20 + $0x8] sm:$0xff] }
   0xb   :  { %3438 = vmatpush3.bf16.msra.mxu1 %v3437_v13  ;;  %3439 = vmatprep.subr.bf16.mxu0 %v3596_v3  ;;  %v98_v31 = vld [vmem:[%s4266_s4 + $0xa8] sm:$0xff] }
   0xc   :  { %3445 = vmatprep.subr.bf16.mxu1 %v3596_v3 }
   0xd   :  { %3198 = vmatmul.mubr.msk.f32.vlgmr.msra.gmra.mrb[0].mxu0 %vm165_vm1, %v59_v18 }
   0xe   :  { %3209 = vmatmul.mubr.msk.f32.vlgmr.msra.gmra.mrb[0].mxu1 %vm165_vm1, %v60_v20  ;;  %3441 = vmatpush3.bf16.msra.mxu0 %v3440_v19 }
   0xf   :  { %3447 = vmatpush3.bf16.msra.mxu1 %v3446_v21  ;;  %3442 = vmatprep.subr.bf16.mxu0 %v3596_v3 }
  0x10   :  { %3448 = vmatprep.subr.bf16.mxu1 %v3596_v3  ;;  %3219 = vmatprep.mubr.msk.f32.mxu0 %vm3597_vm0, %v3598_v11 }
  0x11   :  { %24 = vsyncpa [#allocation5], 0  ;;  %3230 = vmatprep.mubr.msk.f32.mxu1 %vm3597_vm0, %v3598_v11  ;;  %v61_v32 = vld [vmem:[%s4284_s20 + $0x10] sm:$0xff]  ;;  %v3452_v33 = vpack.c.bf16 %v94_v29, %v93_v28  ;;  %v62_v34 = vld [vmem:[%s4284_s20 + $0x18] sm:$0xff]  ;;  %v3458_v35 = vpack.c.bf16 %v98_v31, %v97_v30  ;;  %s3599_s21 = smov 120   ;;  %vm753_vm2 = vcmask 64512  }
  0x12   :  { %3444 = vmatpush3.bf16.msra.mxu0 %v3443_v26  ;;  %v95_v36 = vld [vmem:[%s4266_s4 + $0x90] sm:$0xff]  ;;  %v96_v37 = vld [vmem:[%s4266_s4 + $0x98] sm:$0xff]  ;;  %v101_v42 = vld [vmem:[%s4266_s4 + $0xc0] sm:$0xff]  ;;  %s3600_s18 = smov 112   ;;  %vm2862_vm11 = vcmask 523264  }
  0x13   :  { %3450 = vmatpush3.bf16.msra.mxu1 %v3449_v27  ;;  %3451 = vmatprep.subr.bf16.mxu0 %v3596_v3  ;;  %v99_v38 = vld [vmem:[%s4266_s4 + $0xb0] sm:$0xff]  ;;  %v100_v39 = vld [vmem:[%s4266_s4 + $0xb8] sm:$0xff]  ;;  %v3455_v40 = vpack.c.bf16 %v96_v37, %v95_v36  ;;  %v102_v43 = vld [vmem:[%s4266_s4 + $0xc8] sm:$0xff] }
  0x14   :  { %3457 = vmatprep.subr.bf16.mxu1 %v3596_v3  ;;  %v3461_v41 = vpack.c.bf16 %v100_v39, %v99_v38  ;;  %v105_v44 = vld [vmem:[%s4266_s4 + $0xe0] sm:$0xff]  ;;  %v106_v45 = vld [vmem:[%s4266_s4 + $0xe8] sm:$0xff]  ;;  %v3464_v47 = vpack.c.bf16 %v102_v43, %v101_v42  ;;  %v103_v50 = vld [vmem:[%s4266_s4 + $0xd0] sm:$0xff] }
  0x15   :  { %3220 = vmatmul.mubr.msk.f32.vlgmr.msra.gmra.mrb[2].mxu0 %vm165_vm1, %v61_v32  ;;  %v63_v46 = vld [vmem:[%s4284_s20 + $0x20] sm:$0xff]  ;;  %v64_v48 = vld [vmem:[%s4284_s20 + $0x28] sm:$0xff]  ;;  %v3470_v49 = vpack.c.bf16 %v106_v45, %v105_v44  ;;  %v104_v51 = vld [vmem:[%s4266_s4 + $0xd8] sm:$0xff] }
  0x16   :  { %3231 = vmatmul.mubr.msk.f32.vlgmr.msra.gmra.mrb[2].mxu1 %vm165_vm1, %v62_v34  ;;  %3453 = vmatpush3.bf16.msra.mxu0 %v3452_v33  ;;  %v107_v52 = vld [vmem:[%s4266_s4 + $0xf0] sm:$0xff]  ;;  %v108_v53 = vld [vmem:[%s4266_s4 + $0xf8] sm:$0xff]  ;;  %v3467_v54 = vpack.c.bf16 %v104_v51, %v103_v50  ;;  %v3026_v58 = vld [vmem:[%s4267_s5] ss:$0 sm:$0xff] }
  0x17   :  { %3459 = vmatpush3.bf16.msra.mxu1 %v3458_v35  ;;  %3454 = vmatprep.subr.bf16.mxu0 %v3596_v3  ;;  %v3473_v55 = vpack.c.bf16 %v108_v53, %v107_v52  ;;  %v65_v56 = vld [vmem:[%s4284_s20 + $0x30] sm:$0xff]  ;;  %v66_v57 = vld [vmem:[%s4284_s20 + $0x38] sm:$0xff]  ;;  %v3027_v60 = vld [vmem:[%s4267_s5 + $0x1] ss:$0 sm:$0xff] }
  0x18   :  { %3460 = vmatprep.subr.bf16.mxu1 %v3596_v3  ;;  %3241 = vmatprep.mubr.msk.f32.mxu0 %vm3597_vm0, %v3598_v11  ;;  %v3028_v2 = vld [vmem:[%s4267_s5 + $0x2] ss:$0 sm:$0xff]  ;;  %v3029_v4 = vld [vmem:[%s4267_s5 + $0x3] ss:$0 sm:$0xff]  ;;  %v3030_v10 = vld [vmem:[%s4267_s5 + $0x4] ss:$0 sm:$0xff] }
  0x19   :  { %3252 = vmatprep.mubr.msk.f32.mxu1 %vm3597_vm0, %v3598_v11  ;;  %v3031_v12 = vld [vmem:[%s4267_s5 + $0x5] ss:$0 sm:$0xff]  ;;  %v3032_v19 = vld [vmem:[%s4267_s5 + $0x6] ss:$0 sm:$0xff]  ;;  %v3033_v20 = vld [vmem:[%s4267_s5 + $0x7] ss:$0 sm:$0xff] }
  0x1a   :  { %3456 = vmatpush3.bf16.msra.mxu0 %v3455_v40  ;;  %v69_v35 = vld [vmem:[%s4265_s3] sm:$0xff]  ;;  %v70_v39 = vld [vmem:[%s4265_s3 + $0x8] sm:$0xff]  ;;  %v71_v45 = vld [vmem:[%s4265_s3 + $0x10] sm:$0xff]  ;;  %s4285_s5 = sld [smem:[#allocation8_spill]] }
  0x1b   :  { %3462 = vmatpush3.bf16.msra.mxu1 %v3461_v41  ;;  %3463 = vmatprep.subr.bf16.mxu0 %v3596_v3  ;;  %vm1375_vm3 = vcmp.gt.f32.partialorder %v69_v35, 0.0  ;;  %vm1376_vm4 = vcmp.gt.f32.partialorder %v70_v39, 0.0  ;;  %vm1377_vm5 = vcmp.gt.f32.partialorder %v71_v45, 0.0  ;;  %v72_v51 = vld [vmem:[%s4265_s3 + $0x18] sm:$0xff] }
  0x1c   :  { %3469 = vmatprep.subr.bf16.mxu1 %v3596_v3  ;;  %vm1378_vm6 = vcmp.gt.f32.partialorder %v72_v51, 0.0 }
  0x1d   :  { %3242 = vmatmul.mubr.msk.f32.vlgmr.msra.gmra.mrb[4].mxu0 %vm165_vm1, %v63_v46 }
  0x1e   :  { %3253 = vmatmul.mubr.msk.f32.vlgmr.msra.gmra.mrb[4].mxu1 %vm165_vm1, %v64_v48  ;;  %3465 = vmatpush3.bf16.msra.mxu0 %v3464_v47 }
  0x1f   :  { %3471 = vmatpush3.bf16.msra.mxu1 %v3470_v49  ;;  %3466 = vmatprep.subr.bf16.mxu0 %v3596_v3 }
  0x20   :  { %3472 = vmatprep.subr.bf16.mxu1 %v3596_v3  ;;  %3263 = vmatprep.mubr.msk.f32.mxu0 %vm3597_vm0, %v3598_v11 }
  0x21   :  { %3274 = vmatprep.mubr.msk.f32.mxu1 %vm3597_vm0, %v3598_v11 }
  0x22   :  { %3468 = vmatpush3.bf16.msra.mxu0 %v3467_v54 }
  0x23   :  { %3474 = vmatpush3.bf16.msra.mxu1 %v3473_v55  ;;  %3277 = vmatprep.subr.mxu0 %v3598_v11 }
  0x24   :  { %3292 = vmatprep.subr.mxu1 %v3598_v11 }
  0x25   :  { %3264 = vmatmul.mubr.msk.f32.vlgmr.msra.gmra.mrb[6].mxu0 %vm165_vm1, %v65_v56 }
  0x26   :  { %3275 = vmatmul.mubr.msk.f32.vlgmr.msra.gmra.mrb[6].mxu1 %vm165_vm1, %v66_v57  ;;  %3279 = vmatprep.mubr.msk.f32.mxu0 %vm3597_vm0, %v3598_v11  ;;  %v73_v57 = vld [vmem:[%s4265_s3 + $0x20] sm:$0xff] }
  0x27   :  { %3294 = vmatprep.mubr.msk.f32.mxu1 %vm3597_vm0, %v3598_v11  ;;  %vm1379_vm7 = vcmp.gt.f32.partialorder %v73_v57, 0.0 }
  0xe0   :  { %v235_v59 = vpop.f32.mrb[0].mxu0 }
  0xe1   :  { %v3867_v61 = vadd.f32 %v3026_v58, %v235_v59  ;;  %v3199_v62 = vpop.f32.mrb[1].mxu0  ;;  %v308_v63 = vpop.f32.mrb[0].mxu1  ;;  %v74_v58 = vld [vmem:[%s4265_s3 + $0x28] sm:$0xff] }
  0xe2   :  { %v3210_v0 = vpop.f32.mrb[1].mxu1  ;;  %v3871_v1 = vadd.f32 %v3027_v60, %v308_v63  ;;  %vm1380_vm8 = vcmp.gt.f32.partialorder %v74_v58, 0.0 }
  0xe3   :  { %751 = vrot.lane.b32.xlu0 %v3867_v61, %s3599_s21 }
  0xe7   :  { %829 = vrot.lane.b32.xlu0 %v3871_v1, %s3599_s21 }
  0xe8   :  { %v381_v3 = vpop.f32.mrb[2].mxu0 }
  0xe9   :  { %v3881_v5 = vadd.f32 %v3028_v2, %v381_v3  ;;  %v3221_v6 = vpop.f32.mrb[3].mxu0  ;;  %v454_v7 = vpop.f32.mrb[2].mxu1 }
  0xea   :  { %v3232_v8 = vpop.f32.mrb[3].mxu1  ;;  %v3885_v9 = vadd.f32 %v3029_v4, %v454_v7 }
  0xeb   :  { %906 = vrot.lane.b32.xlu1 %v3881_v5, %s3599_s21 }
  0xef   :  { %983 = vrot.lane.b32.xlu1 %v3885_v9, %s3599_s21 }
  0xf0   :  { %v527_v13 = vpop.f32.mrb[4].mxu0 }
  0xf1   :  { %v3895_v14 = vadd.f32 %v3030_v10, %v527_v13  ;;  %v600_v15 = vpop.f32.mrb[4].mxu1  ;;  %v3243_v16 = vpop.f32.mrb[5].mxu0  ;;  %v76_v13 = vld [vmem:[%s4265_s3 + $0x38] sm:$0xff] }
  0xf2   :  { %v3897_v17 = vadd.f32 %v3031_v12, %v600_v15  ;;  %v3254_v18 = vpop.f32.mrb[5].mxu1  ;;  %v75_v12 = vld [vmem:[%s4265_s3 + $0x30] sm:$0xff]  ;;  %vm1382_vm10 = vcmp.gt.f32.partialorder %v76_v13, 0.0 }
  0xf3   :  { %1060 = vrot.lane.b32.xlu0 %v3895_v14, %s3599_s21  ;;  %vm1381_vm9 = vcmp.gt.f32.partialorder %v75_v12, 0.0 }
  0xf4   :  { %1137 = vrot.lane.b32.xlu1 %v3897_v17, %s3599_s21 }
  0xf8   :  { %v673_v21 = vpop.f32.mrb[6].mxu0 }
  0xf9   :  { %v3909_v22 = vadd.f32 %v3032_v19, %v673_v21  ;;  %v746_v23 = vpop.f32.mrb[6].mxu1  ;;  %v3265_v24 = vpop.f32.mrb[7].mxu0 }
  0xfa   :  { %v3911_v25 = vadd.f32 %v3033_v20, %v746_v23  ;;  %v3276_v26 = vpop.f32.mrb[7].mxu1 }
  0xfb   :  { %1214 = vrot.lane.b32.xlu0 %v3909_v22, %s3599_s21 }
  0xfc   :  { %1291 = vrot.lane.b32.xlu1 %v3911_v25, %s3599_s21 }
 0x155   :  { %v752_v27 = vpop.permute.xlu0 %751 }
 0x156   :  { %3278 = vmatpush3.xpose.msk.msra.mxu0 %vm753_vm2, %v752_v27 }
 0x157   :  { %3282 = vmatprep.subr.mxu0 %v3598_v11 }
 0x159   :  { %3280 = vmatmul.mubr.msk.f32.vlgmr.msra.gmra.mrb[8].mxu0 %vm753_vm2, %v3867_v61  ;;  %v830_v28 = vpop.permute.xlu0 %829 }
 0x15a   :  { %3283 = vmatpush3.xpose.msk.msra.mxu0 %vm753_vm2, %v830_v28  ;;  %3284 = vmatprep.mubr.msk.f32.mxu0 %vm3597_vm0, %v3598_v11 }
 0x15b   :  { %3287 = vmatprep.subr.mxu0 %v3598_v11 }
 0x15d   :  { %3285 = vmatmul.mubr.msk.f32.vlgmr.msra.gmra.mrb[10].mxu0 %vm753_vm2, %v3871_v1  ;;  %v907_v29 = vpop.permute.xlu1 %906 }
 0x15e   :  { %3288 = vmatpush3.xpose.msk.msra.mxu0 %vm753_vm2, %v907_v29  ;;  %3289 = vmatprep.mubr.msk.f32.mxu0 %vm3597_vm0, %v3598_v11 }
 0x15f   :  { %3297 = vmatprep.subr.mxu0 %v3598_v11 }
 0x161   :  { %3290 = vmatmul.mubr.msk.f32.vlgmr.msra.gmra.mrb[12].mxu0 %vm753_vm2, %v3881_v5  ;;  %v984_v30 = vpop.permute.xlu1 %983 }
 0x162   :  { %3293 = vmatpush3.xpose.msk.msra.mxu1 %vm753_vm2, %v984_v30  ;;  %3299 = vmatprep.mubr.msk.f32.mxu0 %vm3597_vm0, %v3598_v11 }
 0x163   :  { %3302 = vmatprep.subr.mxu1 %v3598_v11 }
 0x165   :  { %3295 = vmatmul.mubr.msk.f32.vlgmr.msra.gmra.mrb[8].mxu1 %vm753_vm2, %v3885_v9  ;;  %v1061_v31 = vpop.permute.xlu0 %1060 }
 0x166   :  { %v1138_v32 = vpop.permute.xlu1 %1137  ;;  %3298 = vmatpush3.xpose.msk.msra.mxu0 %vm753_vm2, %v1061_v31  ;;  %3304 = vmatprep.mubr.msk.f32.mxu1 %vm3597_vm0, %v3598_v11 }
 0x167   :  { %3303 = vmatpush3.xpose.msk.msra.mxu1 %vm753_vm2, %v1138_v32  ;;  %3307 = vmatprep.subr.mxu0 %v3598_v11 }
 0x168   :  { %3312 = vmatprep.subr.mxu1 %v3598_v11 }
 0x169   :  { %3300 = vmatmul.mubr.msk.f32.vlgmr.msra.gmra.mrb[14].mxu0 %vm753_vm2, %v3895_v14 }
 0x16a   :  { %3305 = vmatmul.mubr.msk.f32.vlgmr.msra.gmra.mrb[10].mxu1 %vm753_vm2, %v3897_v17  ;;  %3309 = vmatprep.mubr.msk.f32.mxu0 %vm3597_vm0, %v3598_v11 }
 0x16b   :  { %3314 = vmatprep.mubr.msk.f32.mxu1 %vm3597_vm0, %v3598_v11 }
 0x16d   :  { %v1215_v33 = vpop.permute.xlu0 %1214 }
 0x16e   :  { %v1292_v34 = vpop.permute.xlu1 %1291  ;;  %3308 = vmatpush3.xpose.msk.msra.mxu0 %vm753_vm2, %v1215_v33 }
 0x16f   :  { %3313 = vmatpush3.xpose.msk.msra.mxu1 %vm753_vm2, %v1292_v34  ;;  %3317 = vmatprep.subr.mxu0 %v3598_v11 }
 0x170   :  { %3322 = vmatprep.subr.mxu1 %v3598_v11 }
 0x171   :  { %3310 = vmatmul.mubr.msk.f32.vlgmr.msra.gmra.mrb[16].mxu0 %vm753_vm2, %v3909_v22 }
 0x172   :  { %3315 = vmatmul.mubr.msk.f32.vlgmr.msra.gmra.mrb[12].mxu1 %vm753_vm2, %v3911_v25  ;;  %3319 = vmatprep.mubr.msk.f32.mxu0 %vm3597_vm0, %v3598_v11 }
 0x173   :  { %3324 = vmatprep.mubr.msk.f32.mxu1 %vm3597_vm0, %v3598_v11 }
 0x22c   :  { %v824_v36 = vpop.f32.mrb[8].mxu0 }
 0x22d   :  { %v1367_v37 = vmul.f32 0.35355338, %v824_v36  ;;  %v3281_v38 = vpop.f32.mrb[9].mxu0 }
 0x22f   :  { %v3971_v40 = vsel %vm1375_vm3, -1e+30, %v1367_v37 }
 0x230   :  { %v901_v41 = vpop.f32.mrb[10].mxu0  ;;  %v1391_v42 = vsel %vm753_vm2, %v3971_v40, -inf }
 0x231   :  { %v1368_v43 = vmul.f32 0.35355338, %v901_v41  ;;  %1392 = vmax.xlane.f32.xlu0 %v1391_v42  ;;  %v3286_v44 = vpop.f32.mrb[11].mxu0 }
 0x233   :  { %v3978_v46 = vsel %vm1376_vm4, -1e+30, %v1368_v43 }
 0x234   :  { %v978_v47 = vpop.f32.mrb[12].mxu0  ;;  %v1394_v48 = vsel %vm753_vm2, %v3978_v46, -inf }
 0x235   :  { %v1369_v49 = vmul.f32 0.35355338, %v978_v47  ;;  %1395 = vmax.xlane.f32.xlu1 %v1394_v48  ;;  %v3291_v50 = vpop.f32.mrb[13].mxu0 }
 0x237   :  { %v1385_v52 = vsel %vm1377_vm5, -1e+30, %v1369_v49 }
 0x238   :  { %v1055_v53 = vpop.f32.mrb[8].mxu1  ;;  %v1397_v54 = vsel %vm753_vm2, %v1385_v52, -inf }
 0x239   :  { %v1370_v55 = vmul.f32 0.35355338, %v1055_v53  ;;  %v3296_v56 = vpop.f32.mrb[9].mxu1  ;;  %1398 = vmax.xlane.f32.xlu0 %v1397_v54 }
 0x23b   :  { %v1386_v59 = vsel %vm1378_vm6, -1e+30, %v1370_v55 }
 0x23c   :  { %v1132_v60 = vpop.f32.mrb[14].mxu0  ;;  %v1400_v62 = vsel %vm753_vm2, %v1386_v59, -inf }
 0x23d   :  { %v1371_v63 = vmul.f32 0.35355338, %v1132_v60  ;;  %v1209_v0 = vpop.f32.mrb[10].mxu1  ;;  %1401 = vmax.xlane.f32.xlu0 %v1400_v62  ;;  %v3301_v2 = vpop.f32.mrb[15].mxu0 }
 0x23e   :  { %v1372_v3 = vmul.f32 0.35355338, %v1209_v0  ;;  %v3306_v4 = vpop.f32.mrb[11].mxu1 }
 0x23f   :  { %v1387_v6 = vsel %vm1379_vm7, -1e+30, %v1371_v63 }
 0x240   :  { %v1388_v7 = vsel %vm1380_vm8, -1e+30, %v1372_v3  ;;  %v1403_v8 = vsel %vm753_vm2, %v1387_v6, -inf }
 0x241   :  { %v1406_v10 = vsel %vm753_vm2, %v1388_v7, -inf  ;;  %1404 = vmax.xlane.f32.xlu1 %v1403_v8 }
 0x242   :  { %1407 = vmax.xlane.f32.xlu0 %v1406_v10 }
 0x244   :  { %v1286_v15 = vpop.f32.mrb[16].mxu0 }
 0x245   :  { %v1373_v16 = vmul.f32 0.35355338, %v1286_v15  ;;  %v1363_v18 = vpop.f32.mrb[12].mxu1  ;;  %v3311_v19 = vpop.f32.mrb[17].mxu0 }
 0x246   :  { %v1374_v20 = vmul.f32 0.35355338, %v1363_v18  ;;  %v3316_v21 = vpop.f32.mrb[13].mxu1 }
 0x247   :  { %v1389_v23 = vsel %vm1381_vm9, -1e+30, %v1373_v16 }
 0x248   :  { %v1390_v24 = vsel %vm1382_vm10, -1e+30, %v1374_v20  ;;  %v1409_v26 = vsel %vm753_vm2, %v1389_v23, -inf }
 0x249   :  { %v1412_v27 = vsel %vm753_vm2, %v1390_v24, -inf  ;;  %1410 = vmax.xlane.f32.xlu1 %v1409_v26 }
 0x24a   :  { %1413 = vmax.xlane.f32.xlu0 %v1412_v27 }
 0x25a   :  { %1487 = vrot.lane.b32.xlu1 %v3867_v61, %s3600_s18 }
 0x25e   :  { %1639 = vrot.lane.b32.xlu1 %v3881_v5, %s3600_s18 }
 0x260   :  { %1563 = vrot.lane.b32.xlu0 %v3871_v1, %s3600_s18 }
 0x262   :  { %1715 = vrot.lane.b32.xlu1 %v3885_v9, %s3600_s18 }
 0x264   :  { %1791 = vrot.lane.b32.xlu0 %v3895_v14, %s3600_s18 }
 0x266   :  { %1867 = vrot.lane.b32.xlu1 %v3897_v17, %s3600_s18 }
 0x2be   :  { %v1393_v28 = vpop.xlane.xlu0 %1392 }
 0x2bf   :  { %v1415_v29 = vsub.f32 %v3971_v40, %v1393_v28 }
 0x2c1   :  { %v1423_v30 = vmul.f32 1.442695, %v1415_v29 }
 0x2c2   :  { %v1396_v61 = vpop.xlane.xlu1 %1395 }
 0x2c3   :  { %3508 = vpow2.f32 %v1423_v30  ;;  %v1416_v5 = vsub.f32 %v3978_v46, %v1396_v61 }
 0x2c5   :  { %v1425_v31 = vmul.f32 1.442695, %v1416_v5 }
 0x2c6   :  { %v1399_v32 = vpop.xlane.xlu0 %1398 }
 0x2c7   :  { %3510 = vpow2.f32 %v1425_v31  ;;  %v1417_v1 = vsub.f32 %v1385_v52, %v1399_v32 }
 0x2c9   :  { %v1427_v33 = vmul.f32 1.442695, %v1417_v1 }
 0x2ca   :  { %v1402_v9 = vpop.xlane.xlu0 %1401 }
 0x2cb   :  { %3512 = vpow2.f32 %v1427_v33  ;;  %v1418_v34 = vsub.f32 %v1386_v59, %v1402_v9  ;;  %v2095_v9 = vld [vmem:[%s4268_s6] sm:$0xff] }
 0x2cd   :  { %v3509_v14 = vpop.eup %3508  ;;  %v1429_v35 = vmul.f32 1.442695, %v1418_v34  ;;  %v2096_v34 = vld [vmem:[%s4268_s6 + $0x8] sm:$0xff] }
 0x2ce   :  { %v1405_v36 = vpop.xlane.xlu1 %1404  ;;  %v1439_v17 = vsel %vm753_vm2, %v3509_v14, 0.0 }
 0x2cf   :  { %3514 = vpow2.f32 %v1429_v35  ;;  %v1408_v37 = vpop.xlane.xlu0 %1407  ;;  %v1419_v38 = vsub.f32 %v1387_v6, %v1405_v36  ;;  %1440 = vadd.xlane.f32.xlu1 %v1439_v17  ;;  %v2098_v17 = vld [vmem:[%s4268_s6 + $0x18] sm:$0xff] }
 0x2d0   :  { %v1420_v39 = vsub.f32 %v1388_v7, %v1408_v37 }
 0x2d1   :  { %v3511_v40 = vpop.eup %3510  ;;  %v1431_v41 = vmul.f32 1.442695, %v1419_v38 }
 0x2d2   :  { %v1433_v42 = vmul.f32 1.442695, %v1420_v39  ;;  %v1442_v43 = vsel %vm753_vm2, %v3511_v40, 0.0  ;;  %v2099_v39 = vld [vmem:[%s4268_s6 + $0x20] sm:$0xff] }
 0x2d3   :  { %3516 = vpow2.f32 %v1431_v41  ;;  %1443 = vadd.xlane.f32.xlu0 %v1442_v43 }
 0x2d4   :  { %3518 = vpow2.f32 %v1433_v42  ;;  %v2100_v42 = vld [vmem:[%s4268_s6 + $0x28] sm:$0xff] }
 0x2d5   :  { %v4019_v44 = vpop.eup %3512 }
 0x2d6   :  { %v1411_v45 = vpop.xlane.xlu1 %1410  ;;  %v1445_v46 = vsel %vm753_vm2, %v4019_v44, 0.0 }
 0x2d7   :  { %v1414_v47 = vpop.xlane.xlu0 %1413  ;;  %v1421_v48 = vsub.f32 %v1389_v23, %v1411_v45  ;;  %1446 = vadd.xlane.f32.xlu1 %v1445_v46  ;;  %v2101_v45 = vld [vmem:[%s4268_s6 + $0x30] sm:$0xff] }
 0x2d8   :  { %v1422_v49 = vsub.f32 %v1390_v24, %v1414_v47  ;;  %v2102_v47 = vld [vmem:[%s4268_s6 + $0x38] sm:$0xff] }
 0x2d9   :  { %v4023_v50 = vpop.eup %3514  ;;  %v1435_v51 = vmul.f32 1.442695, %v1421_v48 }
 0x2da   :  { %v1437_v52 = vmul.f32 1.442695, %v1422_v49  ;;  %v1488_v53 = vpop.permute.xlu1 %1487  ;;  %v1448_v54 = vsel %vm753_vm2, %v4023_v50, 0.0 }
 0x2db   :  { %3520 = vpow2.f32 %v1435_v51  ;;  %v1564_v55 = vpop.permute.xlu0 %1563  ;;  %1449 = vadd.xlane.f32.xlu0 %v1448_v54  ;;  %3318 = vmatpush3.msra.mxu0 %v1488_v53 }
 0x2dc   :  { %3522 = vpow2.f32 %v1437_v52  ;;  %3323 = vmatpush3.msra.mxu1 %v1564_v55  ;;  %3327 = vmatprep.subr.mxu0 %v3598_v11 }
 0x2dd   :  { %v4028_v56 = vpop.eup %3516  ;;  %3332 = vmatprep.subr.mxu1 %v3598_v11 }
 0x2de   :  { %v4031_v57 = vpop.eup %3518  ;;  %v1451_v58 = vsel %vm753_vm2, %v4028_v56, 0.0  ;;  %v1640_v2 = vpop.permute.xlu1 %1639 }
 0x2df   :  { %v1454_v59 = vsel %vm753_vm2, %v4031_v57, 0.0  ;;  %1452 = vadd.xlane.f32.xlu1 %v1451_v58  ;;  %v1792_v6 = vpop.permute.xlu0 %1791 }
 0x2e0   :  { %1455 = vadd.xlane.f32.xlu0 %v1454_v59 }
 0x2e2   :  { %v1716_v3 = vpop.permute.xlu1 %1715 }
 0x2e5   :  { %v4037_v60 = vpop.eup %3520 }
 0x2e6   :  { %v4039_v62 = vpop.eup %3522  ;;  %v1457_v63 = vsel %vm753_vm2, %v4037_v60, 0.0  ;;  %v1868_v4 = vpop.permute.xlu1 %1867 }
 0x2e7   :  { %v1460_v0 = vsel %vm753_vm2, %v4039_v62, 0.0  ;;  %1458 = vadd.xlane.f32.xlu1 %v1457_v63 }
 0x2e8   :  { %1461 = vadd.xlane.f32.xlu0 %v1460_v0 }
 0x2f8   :  { %2019 = vrot.lane.b32.xlu1 %v3911_v25, %s3600_s18 }
 0x2fe   :  { %1943 = vrot.lane.b32.xlu0 %v3909_v22, %s3600_s18 }
 0x35c   :  { %v1441_v7 = vpop.xlane.xlu1 %1440 }
 0x35d   :  { %3524 = vrcp.f32 %v1441_v7 }
 0x360   :  { %v1444_v8 = vpop.xlane.xlu0 %1443 }
 0x361   :  { %3526 = vrcp.f32 %v1444_v8 }
 0x364   :  { %v1447_v10 = vpop.xlane.xlu1 %1446 }
 0x365   :  { %3528 = vrcp.f32 %v1447_v10 }
 0x367   :  { %v3525_v12 = vpop.eup %3524 }
 0x368   :  { %v1471_v13 = vmul.f32 %v3525_v12, %v3509_v14  ;;  %v1450_v15 = vpop.xlane.xlu0 %1449  ;;  %v2097_v14 = vld [vmem:[%s4268_s6 + $0x10] sm:$0xff]  ;;  %v3074_v12 = vld [vmem:[%s4269_s7] ss:$0 sm:$0xff] }
 0x369   :  { %3530 = vrcp.f32 %v1450_v15 }
 0x36a   :  { %1479 = vst.msk [vmem:[#allocation4] sm:$0xff] %vm753_vm2, %v1471_v13  ;;  %3320 = vmatmul.mubr.msk.f32.vlgmr.msra.gmra.mrb[18].mxu0 %vm753_vm2, %v1471_v13 }
 0x36b   :  { %v3527_v25 = vpop.eup %3526  ;;  %3328 = vmatpush3.msra.mxu0 %v1640_v2  ;;  %3329 = vmatprep.mubr.msk.f32.mxu0 %vm3597_vm0, %v3598_v11 }
 0x36c   :  { %v1472_v22 = vmul.f32 %v3527_v25, %v3511_v40  ;;  %v1453_v16 = vpop.xlane.xlu1 %1452  ;;  %3337 = vmatprep.subr.mxu0 %v3598_v11 }
 0x36d   :  { %v1456_v18 = vpop.xlane.xlu0 %1455  ;;  %3532 = vrcp.f32 %v1453_v16 }
 0x36e   :  { %1480 = vst.msk [vmem:[#allocation4 + $0x8] sm:$0xff] %vm753_vm2, %v1472_v22  ;;  %3534 = vrcp.f32 %v1456_v18  ;;  %3325 = vmatmul.mubr.msk.f32.vlgmr.msra.gmra.mrb[14].mxu1 %vm753_vm2, %v1472_v22  ;;  %v57_v18 = vld [vmem:[%s4285_s5] sm:$0xff] }
 0x36f   :  { %v3529_v19 = vpop.eup %3528  ;;  %3333 = vmatpush3.msra.mxu1 %v1716_v3  ;;  %3334 = vmatprep.mubr.msk.f32.mxu1 %vm3597_vm0, %v3598_v11 }
 0x370   :  { %v1473_v20 = vmul.f32 %v3529_v19, %v4019_v44  ;;  %3342 = vmatprep.subr.mxu1 %v3598_v11 }
 0x372   :  { %1481 = vst.msk [vmem:[#allocation4 + $0x10] sm:$0xff] %vm753_vm2, %v1473_v20  ;;  %3330 = vmatmul.mubr.msk.f32.vlgmr.msra.gmra.mrb[20].mxu0 %vm753_vm2, %v1473_v20  ;;  %v58_v20 = vld [vmem:[%s4285_s5 + $0x8] sm:$0xff] }
 0x373   :  { %v3531_v21 = vpop.eup %3530  ;;  %3338 = vmatpush3.msra.mxu0 %v1792_v6  ;;  %3339 = vmatprep.mubr.msk.f32.mxu0 %vm3597_vm0, %v3598_v11 }
 0x374   :  { %v1474_v23 = vmul.f32 %v3531_v21, %v4023_v50  ;;  %v1459_v24 = vpop.xlane.xlu1 %1458  ;;  %3347 = vmatprep.subr.mxu0 %v3598_v11 }
 0x375   :  { %v1462_v26 = vpop.xlane.xlu0 %1461  ;;  %3536 = vrcp.f32 %v1459_v24 }
 0x376   :  { %1482 = vst.msk [vmem:[#allocation4 + $0x18] sm:$0xff] %vm753_vm2, %v1474_v23  ;;  %3538 = vrcp.f32 %v1462_v26  ;;  %3335 = vmatmul.mubr.msk.f32.vlgmr.msra.gmra.mrb[16].mxu1 %vm753_vm2, %v1474_v23 }
 0x377   :  { %v3533_v27 = vpop.eup %3532  ;;  %3343 = vmatpush3.msra.mxu1 %v1868_v4  ;;  %3344 = vmatprep.mubr.msk.f32.mxu1 %vm3597_vm0, %v3598_v11 }
 0x378   :  { %v3535_v28 = vpop.eup %3534  ;;  %v1475_v29 = vmul.f32 %v3533_v27, %v4028_v56  ;;  %3352 = vmatprep.subr.mxu1 %v3598_v11  ;;  %v2020_v5 = vpop.permute.xlu1 %2019 }
 0x379   :  { %v1476_v30 = vmul.f32 %v3535_v28, %v4031_v57  ;;  %v1944_v61 = vpop.permute.xlu0 %1943 }
 0x37a   :  { %1483 = vst.msk [vmem:[#allocation4 + $0x20] sm:$0xff] %vm753_vm2, %v1475_v29  ;;  %3340 = vmatmul.mubr.msk.f32.vlgmr.msra.gmra.mrb[22].mxu0 %vm753_vm2, %v1475_v29 }
 0x37b   :  { %1484 = vst.msk [vmem:[#allocation4 + $0x28] sm:$0xff] %vm753_vm2, %v1476_v30  ;;  %3345 = vmatmul.mubr.msk.f32.vlgmr.msra.gmra.mrb[18].mxu1 %vm753_vm2, %v1476_v30  ;;  %3348 = vmatpush3.msra.mxu0 %v1944_v61 }
 0x37c   :  { %3353 = vmatpush3.msra.mxu1 %v2020_v5  ;;  %3349 = vmatprep.mubr.msk.f32.mxu0 %vm3597_vm0, %v3598_v11 }
 0x37d   :  { %3354 = vmatprep.mubr.msk.f32.mxu1 %vm3597_vm0, %v3598_v11  ;;  %3357 = vmatprep.subr.mxu0 %v3598_v11 }
 0x37e   :  { %3362 = vmatprep.subr.mxu1 %v3598_v11 }
 0x37f   :  { %v3537_v31 = vpop.eup %3536 }
 0x380   :  { %v3539_v32 = vpop.eup %3538  ;;  %v1477_v1 = vmul.f32 %v3537_v31, %v4037_v60 }
 0x381   :  { %v1478_v33 = vmul.f32 %v3539_v32, %v4039_v62 }
 0x382   :  { %1485 = vst.msk [vmem:[#allocation4 + $0x30] sm:$0xff] %vm753_vm2, %v1477_v1  ;;  %3350 = vmatmul.mubr.msk.f32.vlgmr.msra.gmra.mrb[24].mxu0 %vm753_vm2, %v1477_v1 }
 0x383   :  { %1486 = vst.msk [vmem:[#allocation4 + $0x38] sm:$0xff] %vm753_vm2, %v1478_v33  ;;  %3355 = vmatmul.mubr.msk.f32.vlgmr.msra.gmra.mrb[20].mxu1 %vm753_vm2, %v1478_v33  ;;  %3359 = vmatprep.mubr.msk.f32.mxu0 %vm3597_vm0, %v3598_v11 }
 0x384   :  { %3364 = vmatprep.mubr.msk.f32.mxu1 %vm3597_vm0, %v3598_v11  ;;  %3358 = vmatpush3.msra.mxu0 %v2095_v9 }
 0x385   :  { %3367 = vmatprep.subr.mxu0 %v3598_v11  ;;  %3363 = vmatpush3.msra.mxu1 %v2096_v34  ;;  %v2753_v34 = vld [vmem:[%s4272_s10] sm:$0xff] }
 0x386   :  { %3372 = vmatprep.subr.mxu1 %v3598_v11 }
 0x43d   :  { %v1559_v35 = vpop.f32.mrb[18].mxu0 }
 0x43e   :  { %v3321_v36 = vpop.f32.mrb[19].mxu0  ;;  %3360 = vmatmul.mubr.msk.f32.vlgmr.msra.gmra.mrb[26].mxu0 %vm753_vm2, %v1559_v35 }
 0x43f   :  { %3368 = vmatpush3.msra.mxu0 %v2097_v14  ;;  %3369 = vmatprep.mubr.msk.f32.mxu0 %vm3597_vm0, %v3598_v11  ;;  %v2754_v14 = vld [vmem:[%s4272_s10 + $0x8] sm:$0xff]  ;;  %v2755_v36 = vld [vmem:[%s4272_s10 + $0x10] sm:$0xff] }
 0x440   :  { %3377 = vmatprep.subr.mxu0 %v3598_v11  ;;  %v3475_v35 = vpack.c.bf16 %v2754_v14, %v2753_v34 }
 0x441   :  { %v1635_v37 = vpop.f32.mrb[14].mxu1 }
 0x442   :  { %v3326_v38 = vpop.f32.mrb[15].mxu1  ;;  %3365 = vmatmul.mubr.msk.f32.vlgmr.msra.gmra.mrb[22].mxu1 %vm753_vm2, %v1635_v37 }
 0x443   :  { %3373 = vmatpush3.msra.mxu1 %v2098_v17  ;;  %3374 = vmatprep.mubr.msk.f32.mxu1 %vm3597_vm0, %v3598_v11  ;;  %v2756_v17 = vld [vmem:[%s4272_s10 + $0x18] sm:$0xff]  ;;  %v2847_v38 = vld [vmem:[%s4274_s12] sm:$0xff] }
 0x444   :  { %3382 = vmatprep.subr.mxu1 %v3598_v11  ;;  %v3479_v37 = vpack.c.bf16 %v2756_v17, %v2755_v36 }
 0x445   :  { %v1711_v40 = vpop.f32.mrb[20].mxu0 }
 0x446   :  { %v3331_v41 = vpop.f32.mrb[21].mxu0  ;;  %3370 = vmatmul.mubr.msk.f32.vlgmr.msra.gmra.mrb[28].mxu0 %vm753_vm2, %v1711_v40  ;;  %v2849_v40 = vld [vmem:[%s4274_s12 + $0x10] sm:$0xff] }
 0x447   :  { %3378 = vmatpush3.msra.mxu0 %v2099_v39  ;;  %3379 = vmatprep.mubr.msk.f32.mxu0 %vm3597_vm0, %v3598_v11  ;;  %v2848_v39 = vld [vmem:[%s4274_s12 + $0x8] sm:$0xff] }
 0x448   :  { %3387 = vmatprep.subr.mxu0 %v3598_v11  ;;  %v3483_v41 = vpack.c.bf16 %v2848_v39, %v2847_v38 }
 0x449   :  { %v1787_v43 = vpop.f32.mrb[16].mxu1 }
 0x44a   :  { %v3336_v44 = vpop.f32.mrb[17].mxu1  ;;  %3375 = vmatmul.mubr.msk.f32.vlgmr.msra.gmra.mrb[24].mxu1 %vm753_vm2, %v1787_v43 }
 0x44b   :  { %3383 = vmatpush3.msra.mxu1 %v2100_v42  ;;  %3384 = vmatprep.mubr.msk.f32.mxu1 %vm3597_vm0, %v3598_v11  ;;  %v2850_v42 = vld [vmem:[%s4274_s12 + $0x18] sm:$0xff]  ;;  %v2851_v44 = vld [vmem:[%s4274_s12 + $0x20] sm:$0xff] }
 0x44c   :  { %3392 = vmatprep.subr.mxu1 %v3598_v11  ;;  %v3487_v43 = vpack.c.bf16 %v2850_v42, %v2849_v40 }
 0x44d   :  { %v1863_v46 = vpop.f32.mrb[22].mxu0 }
 0x44e   :  { %v1939_v48 = vpop.f32.mrb[18].mxu1  ;;  %v3341_v49 = vpop.f32.mrb[23].mxu0  ;;  %3380 = vmatmul.mubr.msk.f32.vlgmr.msra.gmra.mrb[30].mxu0 %vm753_vm2, %v1863_v46 }
 0x44f   :  { %v3346_v50 = vpop.f32.mrb[19].mxu1  ;;  %3385 = vmatmul.mubr.msk.f32.vlgmr.msra.gmra.mrb[26].mxu1 %vm753_vm2, %v1939_v48  ;;  %3388 = vmatpush3.msra.mxu0 %v2101_v45  ;;  %v2852_v45 = vld [vmem:[%s4274_s12 + $0x28] sm:$0xff] }
 0x450   :  { %3389 = vmatprep.mubr.msk.f32.mxu0 %vm3597_vm0, %v3598_v11  ;;  %3393 = vmatpush3.msra.mxu1 %v2102_v47  ;;  %v3491_v46 = vpack.c.bf16 %v2852_v45, %v2851_v44 }
 0x451   :  { %3394 = vmatprep.mubr.msk.f32.mxu1 %vm3597_vm0, %v3598_v11  ;;  %3476 = vmatprep.subr.bf16.mxu0 %v3475_v35 }
 0x452   :  { %3484 = vmatprep.subr.bf16.mxu1 %v3483_v41 }
 0x455   :  { %v2015_v51 = vpop.f32.mrb[24].mxu0 }
 0x456   :  { %v2091_v52 = vpop.f32.mrb[20].mxu1  ;;  %v3351_v53 = vpop.f32.mrb[25].mxu0  ;;  %3390 = vmatmul.mubr.msk.f32.vlgmr.msra.gmra.mrb[32].mxu0 %vm753_vm2, %v2015_v51 }
 0x457   :  { %v3356_v54 = vpop.f32.mrb[21].mxu1  ;;  %3395 = vmatmul.mubr.msk.f32.vlgmr.msra.gmra.mrb[28].mxu1 %vm753_vm2, %v2091_v52  ;;  %3478 = vmatpush3.bf16.msra.mxu0 %v3475_v35 }
 0x458   :  { %3480 = vmatprep.subr.bf16.mxu0 %v3479_v37  ;;  %3486 = vmatpush3.bf16.msra.mxu1 %v3483_v41  ;;  %v3075_v54 = vld [vmem:[%s4270_s8] ss:$0 sm:$0xff] }
 0x459   :  { %3488 = vmatprep.subr.bf16.mxu1 %v3487_v43 }
 0x45b   :  { %3482 = vmatpush3.bf16.msra.mxu0 %v3479_v37 }
 0x45c   :  { %3490 = vmatpush3.bf16.msra.mxu1 %v3487_v43 }
 0x45d   :  { %3492 = vmatprep.subr.bf16.mxu1 %v3491_v46 }
 0x460   :  { %3494 = vmatpush3.bf16.msra.mxu1 %v3491_v46 }
 0x511   :  { %v2172_v55 = vpop.f32.mrb[26].mxu0 }
 0x512   :  { %v3361_v56 = vpop.f32.mrb[27].mxu0 }
 0x513   :  { %v3076_v56 = vld [vmem:[%s4271_s9] ss:$0 sm:$0xff] }
 0x515   :  { %v2245_v57 = vpop.f32.mrb[22].mxu1 }
 0x516   :  { %v3366_v58 = vpop.f32.mrb[23].mxu1 }
 0x519   :  { %v2318_v59 = vpop.f32.mrb[28].mxu0 }
 0x51a   :  { %v2688_v60 = vadd.f32 %v2318_v59, %v2172_v55  ;;  %v3371_v62 = vpop.f32.mrb[29].mxu0  ;;  %v4195_v59 = vld [vmem:[%s4264_s2] sm:$0xff] }
 0x51d   :  { %v2391_v63 = vpop.f32.mrb[24].mxu1 }
 0x51e   :  { %v2692_v0 = vadd.f32 %v2391_v63, %v2245_v57  ;;  %v3376_v2 = vpop.f32.mrb[25].mxu1 }
 0x51f   :  { %v4201_v2 = vld [vmem:[%s4264_s2 + $0x8] sm:$0xff] }
 0x521   :  { %v2464_v3 = vpop.f32.mrb[30].mxu0 }
 0x522   :  { %v2689_v11 = vadd.f32 %v2688_v60, %v2464_v3  ;;  %v2537_v4 = vpop.f32.mrb[26].mxu1  ;;  %v3381_v6 = vpop.f32.mrb[31].mxu0 }
 0x523   :  { %v2693_v7 = vadd.f32 %v2692_v0, %v2537_v4  ;;  %v3386_v8 = vpop.f32.mrb[27].mxu1  ;;  %v2853_v4 = vld [vmem:[%s4274_s12 + $0x30] sm:$0xff]  ;;  %v2854_v6 = vld [vmem:[%s4274_s12 + $0x38] sm:$0xff] }
 0x524   :  { %v3077_v8 = vld [vmem:[%s4273_s11] ss:$0 sm:$0xff]  ;;  %s3601_s11 = smov [#allocation4]  }
 0x525   :  { %s3011_s12 = sshll.u32 %s3601_s11, 4  ;;  %s3012_s12 = int_to_ptr.vmem [resolvable:$true] %s3011_s12 }
 0x526   :  { %p3553_p1 = scmp.lt.s32.totalorder %s3012_s12, %s3012_s12 }
 0x529   :  { %v2610_v10 = vpop.f32.mrb[32].mxu0 }
 0x52a   :  { %v2690_v13 = vadd.f32 %v2689_v11, %v2610_v10  ;;  %v2683_v15 = vpop.f32.mrb[28].mxu1  ;;  %v3391_v25 = vpop.f32.mrb[33].mxu0 }
 0x52b   :  { %v2694_v22 = vadd.f32 %v2693_v7, %v2683_v15  ;;  %v3396_v16 = vpop.f32.mrb[29].mxu1  ;;  %v3495_v7 = vpack.c.bf16 %v2854_v6, %v2853_v4 }
 0x52c   :  { %v2702_v19 = vadd.f32 %v3074_v12, %v2690_v13  ;;  %v3080_v16 = vld [vmem:[%s4275_s13] ss:$0 sm:$0xff]  ;;  %s3548_s13 = scalar_lea.vmem %s3012_s12, 1024 }
 0x52d   :  { %v2703_v21 = vadd.f32 %v3074_v12, %v2694_v22  ;;  %3496 = vmatprep.subr.bf16.mxu1 %v3495_v7  ;;  %p3549_p0 = scmp.ne.s32.totalorder %s3012_s12, %s3548_s13  ;;  %p3554_p2 = scmp.lt.s32.totalorder %s3548_s13, %s3548_s13 }
 0x52e   :  { %v2704_v23 = vadd.f32 %v2702_v19, %v57_v18  ;;  %3498 = vmatpush3.bf16.msra.mxu1 %v3495_v7 }
 0x52f   :  { %v2705_v24 = vadd.f32 %v2703_v21, %v58_v20  ;;  %p3555_p3 = por %p3554_p2, %p3553_p1 }
 0x530   :  { %v2708_v26 = vsel %vm165_vm1, %v2704_v23, 0.0 }
 0x531   :  { %v2711_v27 = vsel %vm165_vm1, %v2705_v24, 0.0  ;;  %2709 = vadd.xlane.f32.xlu0 %v2708_v26  ;;  %p3556_p4 = pnand %p3555_p3, %p3549_p0 }
 0x532   :  { %2712 = vadd.xlane.f32.xlu1 %v2711_v27 }
 0x5be   :  { %v2710_v28 = vpop.xlane.xlu0 %2709 }
 0x5bf   :  { %v2713_v29 = vpop.xlane.xlu1 %2712  ;;  %v2715_v30 = vmul.f32 0.03125, %v2710_v28 }
 0x5c0   :  { %v2716_v61 = vmul.f32 0.03125, %v2713_v29 }
 0x5c1   :  { %v2717_v5 = vsub.f32 %v2704_v23, %v2715_v30 }
 0x5c2   :  { %v2718_v31 = vsub.f32 %v2705_v24, %v2716_v61 }
 0x5c3   :  { %v2719_v32 = vmul.f32 %v2717_v5, %v2717_v5 }
 0x5c4   :  { %v2720_v33 = vmul.f32 %v2718_v31, %v2718_v31 }
 0x5c5   :  { %v2721_v1 = vsel %vm165_vm1, %v2719_v32, 0.0 }
 0x5c6   :  { %2722 = vadd.xlane.f32.xlu0 %v2721_v1  ;;  %v2724_v9 = vsel %vm165_vm1, %v2720_v33, 0.0 }
 0x5ca   :  { %2725 = vadd.xlane.f32.xlu0 %v2724_v9 }
 0x653   :  { %v2723_v47 = vpop.xlane.xlu0 %2722 }
 0x654   :  { %v2727_v48 = vmul.f32 0.03125, %v2723_v47 }
 0x656   :  { %v2729_v49 = vadd.f32 1e-05, %v2727_v48 }
 0x657   :  { %v2726_v50 = vpop.xlane.xlu0 %2725 }
 0x658   :  { %3540 = vrsqrt.f32 %v2729_v49  ;;  %v2728_v51 = vmul.f32 0.03125, %v2726_v50 }
 0x65a   :  { %v2730_v52 = vadd.f32 1e-05, %v2728_v51 }
 0x65c   :  { %3542 = vrsqrt.f32 %v2730_v52 }
 0x662   :  { %v3541_v53 = vpop.eup %3540 }
 0x663   :  { %v2733_v55 = vmul.f32 %v3541_v53, %v2717_v5 }
 0x665   :  { %v2741_v57 = vmul.f32 %v3075_v54, %v2733_v55 }
 0x666   :  { %v3543_v58 = vpop.eup %3542 }
 0x667   :  { %v2734_v60 = vmul.f32 %v3543_v58, %v2718_v31  ;;  %v2749_v62 = vadd.f32 %v3076_v56, %v2741_v57 }
 0x669   :  { %v2742_v63 = vmul.f32 %v3075_v54, %v2734_v60  ;;  %v2751_v0 = vmul.f32 %v2749_v62, %v4195_v59 }
 0x66b   :  { %v2750_v3 = vadd.f32 %v3076_v56, %v2742_v63  ;;  %3405 = vmatprep.mubr.msk.f32.mxu0 %vm165_vm1, %v2751_v0 }
 0x66d   :  { %v2752_v11 = vmul.f32 %v2750_v3, %v4201_v2 }
 0x66f   :  { %3406 = vmatmul.mubr.msk.f32.vlgmr.msra.gmra.mrb[34].mxu0 %vm165_vm1, %v2752_v11 }
 0x742   :  { %v3407_v10 = vpop.f32.mrb[34].mxu0 }
 0x743   :  { %v2842_v12 = vadd.f32 %v3407_v10, %v3077_v8  ;;  %v2836_v13 = vpop.f32.mrb[35].mxu0 }
 0x744   :  { %v2837_v15 = vadd.f32 %v3077_v8, %v2836_v13 }
 0x745   :  { %v2846_v22 = vmax.f32 %v2842_v12, 0.0 }
 0x746   :  { %v2845_v25 = vmax.f32 %v2837_v15, 0.0 }
 0x748   :  { %3424 = vmatprep.mubr.msk.f32.mxu1 %vm2862_vm11, %v2845_v25 }
 0x749   :  { %3425 = vmatmul.mubr.msk.f32.vlgmr.msra.gmra.mrb[30].mxu1 %vm2862_vm11, %v2846_v22 }
 0x81c   :  { %v3426_v18 = vpop.f32.mrb[30].mxu1 }
 0x81d   :  { %v2941_v19 = vadd.f32 %v3426_v18, %v3080_v16  ;;  %v2935_v20 = vpop.f32.mrb[31].mxu1 }
 0x81e   :  { %v2936_v21 = vadd.f32 %v3080_v16, %v2935_v20 }
 0x81f   :  { %v2945_v23 = vadd.f32 %v2941_v19, %v2752_v11 }
 0x820   :  { %v2944_v24 = vadd.f32 %v2936_v21, %v2751_v0 }
 0x821   :  { %v2951_v26 = vsel %vm165_vm1, %v2945_v23, 0.0 }
 0x822   :  { %2952 = vadd.xlane.f32.xlu0 %v2951_v26  ;;  %v2948_v27 = vsel %vm165_vm1, %v2944_v24, 0.0 }
 0x823   :  { %2949 = vadd.xlane.f32.xlu1 %v2948_v27 }
 0x8af   :  { %v2953_v28 = vpop.xlane.xlu0 %2952 }
 0x8b0   :  { %v2955_v29 = vmul.f32 0.03125, %v2953_v28  ;;  %v2950_v30 = vpop.xlane.xlu1 %2949 }
 0x8b1   :  { %v2954_v61 = vmul.f32 0.03125, %v2950_v30 }
 0x8b2   :  { %v2957_v5 = vsub.f32 %v2945_v23, %v2955_v29 }
 0x8b3   :  { %v2956_v31 = vsub.f32 %v2944_v24, %v2954_v61 }
 0x8b4   :  { %v2959_v32 = vmul.f32 %v2957_v5, %v2957_v5 }
 0x8b5   :  { %v2958_v1 = vmul.f32 %v2956_v31, %v2956_v31 }
 0x8b6   :  { %v2963_v33 = vsel %vm165_vm1, %v2959_v32, 0.0 }
 0x8b7   :  { %2964 = vadd.xlane.f32.xlu0 %v2963_v33  ;;  %v2960_v9 = vsel %vm165_vm1, %v2958_v1, 0.0 }
 0x8b8   :  { %2961 = vadd.xlane.f32.xlu1 %v2960_v9 }
 0x8b9   :  { %3559 = shalt.err (!%p3556_p4)
}
 0x8ba   :  { %s3560_s30 = scalar_lea.hbm %s4279_s17, 1024 }
 0x8bb   :  { %p3561_p5 = scmp.ne.s32.totalorder %s4279_s17, %s3560_s30  ;;  %p3564_p6 = scmp.lt.u32.totalorder %s3560_s30, %s4279_s17 }
 0x8bd   :  { %p3566_p7 = pnand %p3564_p6, %p3561_p5 }
 0x8bf   :  { %3569 = shalt.err (!%p3566_p7)
}
 0x8c0   :  { %s3602_s19 = smov 128   ;;  %s3603_s20 = smov 8   ;;  %v3083_v39 = vld [vmem:[%s4276_s14] ss:$0 sm:$0xff] }
 0x8c1   :  { %3017 = dma.vmem_to_hbm [thread:$0]  %s3012_s12, 1024, %s4279_s17, [#allocation5], %s3602_s19, %s3602_s19, %s3603_s20  }
 0x8c2   :  { %v3084_v43 = vld [vmem:[%s4277_s15] ss:$0 sm:$0xff]  ;;  %s3604_s17 = smov [#allocation2]  }
 0x8c3   :  { %s2999_s25 = sshll.u32 %s3604_s17, 4  ;;  %s3000_s25 = int_to_ptr.vmem [resolvable:$true] %s2999_s25 }
 0x8c4   :  { %s3570_s14 = scalar_lea.vmem %s3000_s25, 256  ;;  %p3575_p9 = scmp.lt.s32.totalorder %s3000_s25, %s3000_s25 }
 0x8c5   :  { %p3571_p8 = scmp.ne.s32.totalorder %s3000_s25, %s3570_s14  ;;  %p3576_p10 = scmp.lt.s32.totalorder %s3570_s14, %s3570_s14 }
 0x8c7   :  { %p3577_p11 = por %p3576_p10, %p3575_p9 }
 0x8c9   :  { %p3578_p12 = pnand %p3577_p11, %p3571_p8 }
 0x944   :  { %v2965_v34 = vpop.xlane.xlu0 %2964 }
 0x945   :  { %v2967_v14 = vmul.f32 0.03125, %v2965_v34  ;;  %v2962_v35 = vpop.xlane.xlu1 %2961 }
 0x946   :  { %v2966_v36 = vmul.f32 0.03125, %v2962_v35 }
 0x947   :  { %v2969_v17 = vadd.f32 1e-05, %v2967_v14 }
 0x948   :  { %v2968_v37 = vadd.f32 1e-05, %v2966_v36 }
 0x949   :  { %3544 = vrsqrt.f32 %v2969_v17 }
 0x94a   :  { %3546 = vrsqrt.f32 %v2968_v37 }
 0x953   :  { %v3545_v38 = vpop.eup %3544 }
 0x954   :  { %v3547_v40 = vpop.eup %3546  ;;  %v2973_v41 = vmul.f32 %v3545_v38, %v2957_v5 }
 0x955   :  { %v2972_v42 = vmul.f32 %v3547_v40, %v2956_v31 }
 0x956   :  { %v2981_v44 = vmul.f32 %v3083_v39, %v2973_v41 }
 0x957   :  { %v2980_v45 = vmul.f32 %v3083_v39, %v2972_v42 }
 0x958   :  { %v2989_v46 = vadd.f32 %v3084_v43, %v2981_v44 }
 0x959   :  { %v2988_v47 = vadd.f32 %v3084_v43, %v2980_v45 }
 0x95a   :  { %v2991_v48 = vmul.f32 %v2989_v46, %v4201_v2 }
 0x95b   :  { %v2990_v49 = vmul.f32 %v2988_v47, %v4195_v59 }
 0x95c   :  { %2993 = vst.msk [vmem:[#allocation2 + $0x8] sm:$0xff] %vm165_vm1, %v2991_v48 }
 0x95d   :  { %2992 = vst.msk [vmem:[#allocation2] sm:$0xff] %vm165_vm1, %v2990_v49 }
 0x95e   :  { %3581 = shalt.err (!%p3578_p12)
}
 0x95f   :  { %s3582_s9 = scalar_lea.hbm %s4278_s16, 256 }
 0x960   :  { %p3583_p13 = scmp.ne.s32.totalorder %s4278_s16, %s3582_s9  ;;  %p3586_p0 = scmp.lt.u32.totalorder %s3582_s9, %s4278_s16 }
 0x962   :  { %p3588_p1 = pnand %p3586_p0, %p3583_p13 }
 0x964   :  { %3591 = shalt.err (!%p3588_p1)
}
 0x965   :  { %3005 = dma.vmem_to_hbm [thread:$0]  %s3000_s25, 256, %s4278_s16, [#allocation3], %s3602_s19, %s3602_s19, %s3603_s20  }
 0x966   :  { %3592 = dma.done.wait [#allocation3], 256  }
 0x967   :  { %3593 = vsyncadd [#allocation3], 4294967040 }
 0x968   :  { %3594 = dma.done.wait [#allocation5], 1024  }
 0x969   :  { %3595 = vsyncadd [#allocation5], 4294966272 }
 0x96a   :  { %3024 = vsyncpa [#allocation3], 1 }
 0x96b   :  { %3025 = vsyncpa [#allocation5], 1 }

</bundles_post_ra>
